<compile_context>
chip_gen: v6e
topology: v6e:2x2x1
jax: 0.10.0
libtpu: 0.0.40
codegen_flags: <defaults>
</compile_context>

<pallas_src>
import jax
import jax.numpy as jnp
from jax import lax
from jax.experimental import pallas as pl
from jax.experimental.pallas import tpu as pltpu

BN_EPS = 1e-5
NEG_SLOPE = 0.2
VMEM_LIMIT_BYTES = 32 * 1024 * 1024      # safe on v5e/v6e/v7x; raises v5e's 16 MiB default
TM_VMEM_BUDGET = 20 * 1024 * 1024        # budget used to pick TM (leaves headroom under limit)


def _round_up(x, m):
    return (x + m - 1) // m * m


def _pick_tm(m, k_pad, c_pad, budget=TM_VMEM_BUDGET):
    """Largest 128-multiple M tile whose double-buffered working set fits the VMEM budget."""
    per_row = 2 * k_pad * 2 + 2 * c_pad * 2          # 2-buf bf16 patches + 2-buf bf16 conv out
    fixed = 2 * k_pad * c_pad * 2 + 4 * 8 * c_pad * 4  # 2-buf bf16 weight + partial-stat tiles
    tm_cap = max(128, (budget - fixed) // per_row // 128 * 128)
    return max(128, min(2048, _round_up(m, 128), tm_cap))


# ----------------------------------------------------------------------------- Pallas kernels


def _conv_stats_kernel(p_ref, w_ref, conv_ref, psum_ref, pssq_ref):
    """Tiled conv-as-GEMM + per-tile BN partial statistics.

    p_ref:    (TM, Kp)      bf16 im2col patch tile
    w_ref:    (Kp, Cp)      bf16 spectral-normed W^T (constant block index -> fetched once)
    conv_ref: (TM, Cp)      bf16 conv output tile (stats taken from the f32 acc before downcast)
    psum_ref: (8,  Cp)      f32 per-tile partial channel sums (row-phase folded to 8 sublanes)
    pssq_ref: (8,  Cp)      f32 per-tile partial channel sums of squares
    """
    acc = jnp.dot(p_ref[...], w_ref[...], preferred_element_type=jnp.float32)
    conv_ref[...] = acc.astype(conv_ref.dtype)

    # Conv bias is intentionally omitted: it is exactly cancelled by BN mean subtraction.
    a3 = acc.reshape(-1, 8, acc.shape[-1])            # (TM/8, 8, Cp): vreg-aligned split
    psum_ref[...] = jnp.sum(a3, axis=0)
    pssq_ref[...] = jnp.sum(a3 * a3, axis=0)


def _bn_lrelu_kernel(conv_ref, scale_ref, shift_ref, o_ref):
    """Fused BatchNorm (pre-folded per-channel scale/shift) + LeakyReLU(0.2), bf16 in/out."""
    y = conv_ref[...].astype(jnp.float32) * scale_ref[...] + shift_ref[...]
    o_ref[...] = jnp.where(y >= 0, y, NEG_SLOPE * y).astype(o_ref.dtype)


# ----------------------------------------------------------------------------- plain-JAX glue


def spectral_normalize(w, u, eps=1e-12):
    """One power iteration (PyTorch spectral_norm default, training mode)."""
    cout = w.shape[0]
    wm = w.reshape(cout, -1)                          # (Cout, Cin*KH*KW)
    v = wm.T @ u
    v = v / jnp.maximum(jnp.linalg.norm(v), eps)
    u_new = wm @ v
    u_new = u_new / jnp.maximum(jnp.linalg.norm(u_new), eps)
    sigma = u_new @ (wm @ v)
    return w / sigma


def im2col_k4s2p1_bf16(x_nchw, m_pad, k_pad):
    """im2col for kernel=4, stride=2, pad=1 with K order (kh, kw, cin).

    Casts to bf16 during the NCHW->NHWC transpose (before the 16x duplication) and emits a
    single padded bf16 slab of shape (m_pad, k_pad) — only one full-size HBM intermediate.
    """
    N, C, H, W = x_nchw.shape
    ho, wo = H // 2, W // 2
    x = jnp.transpose(x_nchw, (0, 2, 3, 1)).astype(jnp.bfloat16)          # NHWC, bf16
    xp = jnp.pad(x, ((0, 0), (1, 1), (1, 1), (0, 0)))
    cols = [xp[:, kh:kh + 2 * ho:2, kw:kw + 2 * wo:2, :]                  # (N, Ho, Wo, C)
            for kh in range(4) for kw in range(4)]
    p = jnp.stack(cols, axis=3).reshape(N * ho * wo, 16 * C)              # K order = (kh, kw, cin)
    return jnp.pad(p, ((0, m_pad - p.shape[0]), (0, k_pad - p.shape[1])))


def downblock_forward(x_nchw, params):
    w, b, u, gamma, beta = params
    del b  # conv bias is exactly cancelled by training-mode BatchNorm; omitted in fused path.
    cout = w.shape[0]
    N, Cin, H, W = x_nchw.shape
    Ho, Wo = H // 2, W // 2
    M = N * Ho * Wo
    K = Cin * 16

    # Lane-dense / MXU-friendly padded sizes (128 is enough even for the 256-wide MXUs: these
    # blocks are HBM-bound, extra padding would only add bytes).
    K_pad = _round_up(K, 128)
    C_pad = _round_up(cout, 128)
    TM = _pick_tm(M, K_pad, C_pad)
    M_pad = _round_up(M, TM)
    grid_m = M_pad // TM

    # Parameter setup: spectral-normalize the conv weight, reorder to (kh, kw, cin) x cout.
    w_sn = spectral_normalize(w, u)
    wt = jnp.pad(
        jnp.transpose(w_sn, (2, 3, 1, 0)).reshape(K, cout).astype(jnp.bfloat16),
        ((0, K_pad - K), (0, C_pad - cout)))                              # (Kp, Cp) bf16

    # im2col layout transform (single padded bf16 slab).
    patches = im2col_k4s2p1_bf16(x_nchw, M_pad, K_pad)                    # (M_pad, K_pad) bf16

    # ---- Pass 1: tiled GEMM (bf16 x bf16 -> f32 MXU) + per-tile BN partial stats --------------
    conv, psum, pssq = pl.pallas_call(
        _conv_stats_kernel,
        out_shape=(
            jax.ShapeDtypeStruct((M_pad, C_pad), jnp.bfloat16),
            jax.ShapeDtypeStruct((grid_m * 8, C_pad), jnp.float32),
            jax.ShapeDtypeStruct((grid_m * 8, C_pad), jnp.float32),
        ),
        grid=(grid_m,),
        in_specs=[
            pl.BlockSpec((TM, K_pad), lambda i: (i, 0)),
            pl.BlockSpec((K_pad, C_pad), lambda i: (0, 0)),               # weight stays resident
        ],
        out_specs=(
            pl.BlockSpec((TM, C_pad), lambda i: (i, 0)),
            pl.BlockSpec((8, C_pad), lambda i: (i, 0)),                   # per-tile partials
            pl.BlockSpec((8, C_pad), lambda i: (i, 0)),
        ),
        compiler_params=pltpu.CompilerParams(
            dimension_semantics=("parallel",),                            # megacore-shardable
            vmem_limit_bytes=VMEM_LIMIT_BYTES),
        cost_estimate=pl.CostEstimate(
            flops=2 * M_pad * K_pad * C_pad,
            transcendentals=0,
            bytes_accessed=(M_pad * K_pad * 2 + K_pad * C_pad * 2
                            + M_pad * C_pad * 2 + 2 * grid_m * 8 * C_pad * 4),
        ),
    )(patches, wt)

    # ---- Fold BN stats + affine into per-channel scale/shift (tiny, plain JAX) ---------------
    inv_m = 1.0 / float(M)                            # true M: zero-padded rows contribute 0
    mean = jnp.sum(psum, axis=0, keepdims=True) * inv_m                   # (1, Cp)
    ex2 = jnp.sum(pssq, axis=0, keepdims=True) * inv_m
    var = jnp.maximum(ex2 - mean * mean, 0.0)
    gamma_p = jnp.pad(gamma.astype(jnp.float32), (0, C_pad - cout)).reshape(1, C_pad)
    beta_p = jnp.pad(beta.astype(jnp.float32), (0, C_pad - cout)).reshape(1, C_pad)
    scale = gamma_p * lax.rsqrt(var + BN_EPS)
    shift = beta_p - mean * scale

    # ---- Pass 2: elementwise normalize + LeakyReLU (bf16 in / bf16 out, parallel) ------------
    y = pl.pallas_call(
        _bn_lrelu_kernel,
        out_shape=jax.ShapeDtypeStruct((M_pad, C_pad), jnp.bfloat16),
        grid=(grid_m,),
        in_specs=[
            pl.BlockSpec((TM, C_pad), lambda i: (i, 0)),
            pl.BlockSpec((1, C_pad), lambda i: (0, 0)),
            pl.BlockSpec((1, C_pad), lambda i: (0, 0)),
        ],
        out_specs=pl.BlockSpec((TM, C_pad), lambda i: (i, 0)),
        compiler_params=pltpu.CompilerParams(
            dimension_semantics=("parallel",),
            vmem_limit_bytes=VMEM_LIMIT_BYTES),
    )(conv, scale, shift)

    # NCHW f32 module boundary (PyTorch convention). When DownBlocks are stacked, keep the
    # padded lane-dense (M_pad, C_pad) bf16 layout between blocks and convert only once at the
    # stack boundary (the slice + transpose below cost a full HBM pass per block).
    out = y[:M, :cout].astype(jnp.float32).reshape(N, Ho, Wo, cout)
    return jnp.transpose(out, (0, 3, 1, 2))


def reference_forward(x_nchw, params):
    """Pure-JAX reference of the same forward pass (with conv bias; BN cancels it)."""
    w, b, u, gamma, beta = params
    w_sn = spectral_normalize(w, u)
    y = lax.conv_general_dilated(
        x_nchw, w_sn, window_strides=(2, 2), padding=((1, 1), (1, 1)),
        dimension_numbers=("NCHW", "OIHW", "NCHW"),
        precision=lax.Precision.HIGHEST,
    )
    y = y + b.reshape(1, -1, 1, 1)
    mean = jnp.mean(y, axis=(0, 2, 3), keepdims=True)
    var = jnp.mean((y - mean) ** 2, axis=(0, 2, 3), keepdims=True)
    yh = (y - mean) / jnp.sqrt(var + BN_EPS)
    yh = yh * gamma.reshape(1, -1, 1, 1) + beta.reshape(1, -1, 1, 1)
    return jnp.where(yh >= 0, yh, NEG_SLOPE * yh)


if __name__ == "__main__":
    key = jax.random.PRNGKey(0)
    k_x, k_w, k_b, k_u = jax.random.split(key, 4)

    # Small shapes consistent with DownBlock(in_planes=4, out_planes=8).
    N, Cin, H, W = 2, 4, 16, 16
    Cout = 8

    x = jax.random.normal(k_x, (N, Cin, H, W), jnp.float32)

    # Deterministic synthetic parameters (nn.Conv2d(4, 8, 4, 2, 1) + BatchNorm2d(8)).
    w = jax.random.normal(k_w, (Cout, Cin, 4, 4), jnp.float32) * 0.1   # conv weight (OIHW)
    b = jax.random.normal(k_b, (Cout,), jnp.float32) * 0.05            # conv bias
    u = jax.random.normal(k_u, (Cout,), jnp.float32)                   # spectral-norm u vector
    u = u / jnp.linalg.norm(u)
    gamma = jnp.ones((Cout,), jnp.float32)                             # BN affine (fresh init)
    beta = jnp.zeros((Cout,), jnp.float32)
    params = (w, b, u, gamma, beta)

    out = jax.block_until_ready(downblock_forward(x, params))
    ref = jax.block_until_ready(reference_forward(x, params))

    assert out.shape == (N, Cout, H // 2, W // 2), out.shape
    # bf16 MXU operands + bf16 conv/output slabs loosen agreement vs the HIGHEST-precision
    # f32 reference; BN stats themselves are accumulated in f32.
    assert jnp.allclose(out, ref, atol=5e-2, rtol=5e-2), float(jnp.max(jnp.abs(out - ref)))
    print("KERNEL_OK")
</pallas_src>

<mosaic_0001>
module attributes {stable_mosaic.version = 11 : i64} {
  func.func @_conv_stats_kernel(%arg0: i32, %arg1: memref<128x128xbf16, #tpu.memory_space<vmem>>, %arg2: memref<128x128xbf16, #tpu.memory_space<vmem>>, %arg3: memref<128x128xbf16, #tpu.memory_space<vmem>>, %arg4: memref<8x128xf32, #tpu.memory_space<vmem>>, %arg5: memref<8x128xf32, #tpu.memory_space<vmem>>) attributes {dimension_semantics = [#tpu.dimension_semantics<parallel>], iteration_bounds = array<i64: 1>, scalar_prefetch = 0 : i64, scratch_operands = 0 : i64, tpu.core_type = #tpu.core_type<tc>, window_params = [{transform_indices = @transform_0, window_bounds = array<i64: 128, 128>}, {pipeline_mode = #tpu.pipeline_mode<synchronous>, transform_indices = @transform_1, window_bounds = array<i64: 128, 128>}, {transform_indices = @transform_2, window_bounds = array<i64: 128, 128>}, {transform_indices = @transform_3, window_bounds = array<i64: 8, 128>}, {transform_indices = @transform_4, window_bounds = array<i64: 8, 128>}]} {
    %c0 = arith.constant 0 : index
    %c0_0 = arith.constant 0 : index
    %0 = vector.load %arg1[%c0, %c0_0] : memref<128x128xbf16, #tpu.memory_space<vmem>>, vector<128x128xbf16>
    %c0_1 = arith.constant 0 : index
    %c0_2 = arith.constant 0 : index
    %1 = vector.load %arg2[%c0_1, %c0_2] : memref<128x128xbf16, #tpu.memory_space<vmem>>, vector<128x128xbf16>
    %cst = arith.constant dense<0.000000e+00> : vector<128x128xf32>
    %2 = tpu.matmul %0, %1, %cst {dimension_numbers = #tpu.dot_dimension_numbers<[1], [0], [0], [1], [0, 0, 1, 1], [], []>} : vector<128x128xbf16>, vector<128x128xbf16>, vector<128x128xf32> -> vector<128x128xf32>
    %3 = arith.truncf %2 : vector<128x128xf32> to vector<128x128xbf16>
    %c0_3 = arith.constant 0 : index
    %c0_4 = arith.constant 0 : index
    %4 = vector.load %arg3[%c0_3, %c0_4] : memref<128x128xbf16, #tpu.memory_space<vmem>>, vector<128x128xbf16>
    tpu.vector_store %arg3[%c0_3, %c0_4], %3 {strides = array<i32>} : memref<128x128xbf16, #tpu.memory_space<vmem>>, vector<128x128xbf16>,
    %5 = vector.shape_cast %2 : vector<128x128xf32> to vector<16x8x128xf32>
    %cst_5 = arith.constant dense<0.000000e+00> : vector<8x128xf32>
    %6 = vector.multi_reduction <add>, %5, %cst_5 [0] : vector<16x8x128xf32> to vector<8x128xf32>
    %c0_6 = arith.constant 0 : index
    %c0_7 = arith.constant 0 : index
    %7 = vector.load %arg4[%c0_6, %c0_7] : memref<8x128xf32, #tpu.memory_space<vmem>>, vector<8x128xf32>
    tpu.vector_store %arg4[%c0_6, %c0_7], %6 {strides = array<i32>} : memref<8x128xf32, #tpu.memory_space<vmem>>, vector<8x128xf32>,
    %8 = arith.mulf %5, %5 : vector<16x8x128xf32>
    %cst_8 = arith.constant dense<0.000000e+00> : vector<8x128xf32>
    %9 = vector.multi_reduction <add>, %8, %cst_8 [0] : vector<16x8x128xf32> to vector<8x128xf32>
    %c0_9 = arith.constant 0 : index
    %c0_10 = arith.constant 0 : index
    %10 = vector.load %arg5[%c0_9, %c0_10] : memref<8x128xf32, #tpu.memory_space<vmem>>, vector<8x128xf32>
    tpu.vector_store %arg5[%c0_9, %c0_10], %9 {strides = array<i32>} : memref<8x128xf32, #tpu.memory_space<vmem>>, vector<8x128xf32>,
    return
  }
  func.func @transform_0(%arg0: i32) -> (i32, i32) {
    %c0_i32 = arith.constant 0 : i32
    %c0_i32_0 = arith.constant 0 : i32
    return %arg0, %c0_i32 : i32, i32
  }
  func.func @transform_1(%arg0: i32) -> (i32, i32) {
    %c0_i32 = arith.constant 0 : i32
    %c0_i32_0 = arith.constant 0 : i32
    %c0_i32_1 = arith.constant 0 : i32
    return %c0_i32, %c0_i32_0 : i32, i32
  }
  func.func @transform_2(%arg0: i32) -> (i32, i32) {
    %c0_i32 = arith.constant 0 : i32
    %c0_i32_0 = arith.constant 0 : i32
    return %arg0, %c0_i32 : i32, i32
  }
  func.func @transform_3(%arg0: i32) -> (i32, i32) {
    %c0_i32 = arith.constant 0 : i32
    %c0_i32_0 = arith.constant 0 : i32
    return %arg0, %c0_i32 : i32, i32
  }
  func.func @transform_4(%arg0: i32) -> (i32, i32) {
    %c0_i32 = arith.constant 0 : i32
    %c0_i32_0 = arith.constant 0 : i32
    return %arg0, %c0_i32 : i32, i32
  }
}

</mosaic_0001>

<bundles_post_ra>
// kernel: tpu_custom_call.1
= control target key start
LH: loop header
LB: loop body
LE: loop exit
PB: predicated region body
PF: predicated region fallthrough
CT: control target
= control target key end

     0   :  { %10 = vsyncpa [#allocation3], 0  ;;  %s813_s0 = inlined_call_operand.hbm [shape: bf16[128,128], index: 0, kind: input, shape index: {}]   ;;  %s814_s1 = inlined_call_operand.hbm [shape: bf16[128,128], index: 1, kind: input, shape index: {}]   ;;  %s815_s2 = inlined_call_operand.hbm [shape: bf16[128,128], index: 2, kind: output, shape index: {0}]   ;;  %s816_s3 = inlined_call_operand.hbm [shape: f32[8,128], index: 3, kind: output, shape index: {1}]   ;;  %s817_s4 = inlined_call_operand.hbm [shape: f32[8,128], index: 4, kind: output, shape index: {2}]  }
   0x1   :  { %11 = vsyncpa [#allocation6], 0 }
   0x2   :  { %12 = vsyncpa [#allocation4], 0 }
   0x3   :  { %13 = vsyncpa [#allocation9], 0  ;;  %s733_s15 = smov [#allocation2]  }
   0x4   :  { %s19_s16 = sshll.u32 %s733_s15, 4  ;;  %s20_s16 = int_to_ptr.vmem [resolvable:$true] %s19_s16 }
   0x5   :  { %s633_s17 = scalar_lea.vmem %s20_s16, 1024  ;;  %p638_p1 = scmp.lt.s32.totalorder %s20_s16, %s20_s16 }
   0x6   :  { %p634_p0 = scmp.ne.s32.totalorder %s20_s16, %s633_s17  ;;  %p639_p2 = scmp.lt.s32.totalorder %s633_s17, %s633_s17 }
   0x8   :  { %p640_p3 = por %p639_p2, %p638_p1 }
   0xa   :  { %p641_p4 = pnand %p640_p3, %p634_p0 }
   0xc   :  { %644 = shalt.err (!%p641_p4)
}
   0xd   :  { %s734_s18 = smov 64   ;;  %s735_s19 = smov 4  }
   0xe   :  { %25 = dma.hbm_to_vmem [thread:$0]  %s813_s0, 1024, %s20_s16, [#allocation3], %s734_s18, %s734_s18, %s735_s19  }
   0xf   :  { %s736_s22 = smov [#allocation5]  }
  0x10   :  { %s31_s23 = sshll.u32 %s736_s22, 4  ;;  %s32_s23 = int_to_ptr.vmem [resolvable:$true] %s31_s23 }
  0x11   :  { %s653_s24 = scalar_lea.vmem %s32_s23, 1024  ;;  %p658_p6 = scmp.lt.s32.totalorder %s32_s23, %s32_s23 }
  0x12   :  { %p654_p5 = scmp.ne.s32.totalorder %s32_s23, %s653_s24  ;;  %p659_p7 = scmp.lt.s32.totalorder %s653_s24, %s653_s24 }
  0x14   :  { %p660_p8 = por %p659_p7, %p658_p6 }
  0x16   :  { %p661_p9 = pnand %p660_p8, %p654_p5 }
  0x18   :  { %664 = shalt.err (!%p661_p9)
}
  0x19   :  { %37 = dma.hbm_to_vmem [thread:$0]  %s814_s1, 1024, %s32_s23, [#allocation6], %s734_s18, %s734_s18, %s735_s19  }
  0x1a   :  { %725 = dma.done.wait [#allocation3], 1024  }
  0x1b   :  { %726 = vsyncadd [#allocation3], 4294966272 }
  0x1c   :  { %727 = dma.done.wait [#allocation6], 1024  }
  0x1d   :  { %728 = vsyncadd [#allocation6], 4294966272  ;;  %v609_v0 = vld [vmem:[#allocation5 + $0x38] sm:$0xff]   ;;  %v610_v1 = vld [vmem:[#allocation5 + $0x30] sm:$0xff]   ;;  %s737_s0 = smov [#allocation7]  }
  0x1e   :  { %554 = vmatprep.subr.bf16.mxu0 %v609_v0  ;;  %586 = vmatprep.subr.bf16.mxu1 %v609_v0  ;;  %v611_v2 = vld [vmem:[#allocation5 + $0x28] sm:$0xff]   ;;  %v612_v3 = vld [vmem:[#allocation5 + $0x20] sm:$0xff]   ;;  %v613_v5 = vld [vmem:[#allocation5 + $0x18] sm:$0xff]   ;;  %s403_s1 = sshll.u32 %s737_s0, 4  ;;  %s404_s1 = int_to_ptr.vmem [resolvable:$true] %s403_s1 }
  0x1f   :  { %555 = vmatpush3.bf16.msra.mxu0 %v609_v0  ;;  %594 = vmatpush3.bf16.msra.mxu1 %v609_v0  ;;  %v617_v4 = vld [vmem:[#allocation2] sm:$0xff]   ;;  %v614_v7 = vld [vmem:[#allocation5 + $0x10] sm:$0xff]   ;;  %v615_v8 = vld [vmem:[#allocation5 + $0x8] sm:$0xff]   ;;  %s665_s27 = scalar_lea.vmem %s404_s1, 1024  ;;  %p670_p11 = scmp.lt.s32.totalorder %s404_s1, %s404_s1 }
  0x20   :  { %556 = vmatprep.subr.bf16.mxu0 %v610_v1  ;;  %587 = vmatprep.subr.bf16.mxu1 %v610_v1  ;;  %v621_v6 = vld [vmem:[#allocation2 + $0x20] sm:$0xff]   ;;  %v618_v10 = vld [vmem:[#allocation2 + $0x8] sm:$0xff]   ;;  %v619_v12 = vld [vmem:[#allocation2 + $0x10] sm:$0xff]   ;;  %p666_p10 = scmp.ne.s32.totalorder %s404_s1, %s665_s27  ;;  %p671_p12 = scmp.lt.s32.totalorder %s665_s27, %s665_s27 }
  0x21   :  { %570 = vmatprep.mubr.bf16.mxu0 %v617_v4  ;;  %578 = vmatprep.mubr.bf16.mxu1 %v621_v6  ;;  %v616_v9 = vld [vmem:[#allocation5] sm:$0xff]   ;;  %v622_v11 = vld [vmem:[#allocation2 + $0x28] sm:$0xff]   ;;  %v623_v13 = vld [vmem:[#allocation2 + $0x30] sm:$0xff]  }
  0x22   :  { %v620_v14 = vld [vmem:[#allocation2 + $0x18] sm:$0xff]   ;;  %p672_p13 = por %p671_p12, %p670_p11 }
  0x23   :  { %557 = vmatpush3.bf16.msra.mxu0 %v610_v1  ;;  %595 = vmatpush3.bf16.msra.mxu1 %v610_v1  ;;  %v624_v15 = vld [vmem:[#allocation2 + $0x38] sm:$0xff]  }
  0x24   :  { %558 = vmatprep.subr.bf16.mxu0 %v611_v2  ;;  %588 = vmatprep.subr.bf16.mxu1 %v611_v2  ;;  %p673_p0 = pnand %p672_p13, %p666_p10 }
  0x27   :  { %559 = vmatpush3.bf16.msra.mxu0 %v611_v2  ;;  %596 = vmatpush3.bf16.msra.mxu1 %v611_v2 }
  0x28   :  { %560 = vmatprep.subr.bf16.mxu0 %v612_v3  ;;  %589 = vmatprep.subr.bf16.mxu1 %v612_v3 }
  0x2b   :  { %561 = vmatpush3.bf16.msra.mxu0 %v612_v3  ;;  %597 = vmatpush3.bf16.msra.mxu1 %v612_v3 }
  0x2c   :  { %562 = vmatprep.subr.bf16.mxu0 %v613_v5  ;;  %590 = vmatprep.subr.bf16.mxu1 %v613_v5 }
  0x2f   :  { %563 = vmatpush3.bf16.msra.mxu0 %v613_v5  ;;  %598 = vmatpush3.bf16.msra.mxu1 %v613_v5 }
  0x30   :  { %564 = vmatprep.subr.bf16.mxu0 %v614_v7  ;;  %591 = vmatprep.subr.bf16.mxu1 %v614_v7 }
  0x33   :  { %565 = vmatpush3.bf16.msra.mxu0 %v614_v7  ;;  %599 = vmatpush3.bf16.msra.mxu1 %v614_v7 }
  0x34   :  { %566 = vmatprep.subr.bf16.mxu0 %v615_v8  ;;  %592 = vmatprep.subr.bf16.mxu1 %v615_v8 }
  0x37   :  { %567 = vmatpush3.bf16.msra.mxu0 %v615_v8  ;;  %600 = vmatpush3.bf16.msra.mxu1 %v615_v8 }
  0x38   :  { %568 = vmatprep.subr.bf16.mxu0 %v616_v9  ;;  %593 = vmatprep.subr.bf16.mxu1 %v616_v9 }
  0x3b   :  { %569 = vmatpush3.bf16.msra.mxu0 %v616_v9  ;;  %601 = vmatpush3.bf16.msra.mxu1 %v616_v9 }
  0x3e   :  { %571 = vmatmul.mubr.bf16.vlgmr.msra.gmra.mxu0 %v618_v10  ;;  %579 = vmatmul.mubr.bf16.vlgmr.msra.gmra.mxu1 %v622_v11 }
  0x3f   :  { %574 = vmatprep.mubr.bf16.mxu0 %v619_v12  ;;  %582 = vmatprep.mubr.bf16.mxu1 %v623_v13 }
  0x46   :  { %575 = vmatmul.mubr.bf16.gmra.mxu0 %v620_v14  ;;  %583 = vmatmul.mubr.bf16.gmra.mxu1 %v624_v15 }
  0xfe   :  { %v572_v16 = vpop.f32.mrf.mxu0  ;;  %v777_v17 = vpop.f32.mrf.mxu1 }
  0xff   :  { %v368_v33 = vmul.f32 %v572_v16, %v572_v16 }
 0x100   :  { %v207_v18 = vpop.f32.mrf.mxu0  ;;  %v779_v19 = vpop.f32.mrf.mxu1 }
 0x101   :  { %v366_v24 = vmul.f32 %v207_v18, %v207_v18 }
 0x102   :  { %v573_v20 = vpop.f32.mrf.mxu0  ;;  %v781_v21 = vpop.f32.mrf.mxu1 }
 0x103   :  { %v499_v22 = vpack.c.bf16 %v573_v20, %v572_v16  ;;  %v519_v23 = vpack.c.bf16 %v781_v21, %v777_v17  ;;  %v369_v38 = vmul.f32 %v573_v20, %v573_v20 }
 0x104   :  { %v210_v25 = vpop.f32.mrf.mxu0  ;;  %v242_v26 = vpop.f32.mrf.mxu1 }
 0x105   :  { %531 = vst [vmem:[#allocation7 + $0x8] sm:$0xff] %v499_v22   ;;  %v494_v27 = vpack.c.bf16 %v210_v25, %v207_v18  ;;  %v350_v28 = vadd.f32 %v210_v25, %v207_v18  ;;  %v367_v29 = vmul.f32 %v210_v25, %v210_v25  ;;  %535 = vst [vmem:[#allocation7 + $0x28] sm:$0xff] %v519_v23  }
 0x106   :  { %v514_v30 = vpack.c.bf16 %v242_v26, %v779_v19  ;;  %v576_v31 = vpop.f32.mrf.mxu0  ;;  %v786_v32 = vpop.f32.mrf.mxu1 }
 0x107   :  { %495 = vst [vmem:[#allocation7] sm:$0xff] %v494_v27   ;;  %v351_v34 = vadd.f32 %v572_v16, %v350_v28  ;;  %v382_v35 = vadd.f32 %v367_v29, %v366_v24  ;;  %v372_v55 = vmul.f32 %v576_v31, %v576_v31 }
 0x108   :  { %534 = vst [vmem:[#allocation7 + $0x20] sm:$0xff] %v514_v30   ;;  %v223_v36 = vpop.f32.mrf.mxu0  ;;  %v255_v37 = vpop.f32.mrf.mxu1 }
 0x109   :  { %v383_v39 = vadd.f32 %v382_v35, %v368_v33  ;;  %v352_v40 = vadd.f32 %v573_v20, %v351_v34  ;;  %v370_v44 = vmul.f32 %v223_v36, %v223_v36 }
 0x10a   :  { %v577_v41 = vpop.f32.mrf.mxu0  ;;  %v585_v42 = vpop.f32.mrf.mxu1 }
 0x10b   :  { %v353_v43 = vadd.f32 %v352_v40, %v223_v36  ;;  %v384_v45 = vadd.f32 %v383_v39, %v369_v38  ;;  %v509_v46 = vpack.c.bf16 %v577_v41, %v576_v31  ;;  %v529_v48 = vpack.c.bf16 %v585_v42, %v786_v32 }
 0x10c   :  { %v226_v47 = vpop.f32.mrf.mxu0  ;;  %v258_v49 = vpop.f32.mrf.mxu1  ;;  %v373_v58 = vmul.f32 %v577_v41, %v577_v41 }
 0x10d   :  { %v385_v50 = vadd.f32 %v384_v45, %v370_v44  ;;  %533 = vst [vmem:[#allocation7 + $0x18] sm:$0xff] %v509_v46   ;;  %v504_v51 = vpack.c.bf16 %v226_v47, %v223_v36  ;;  %v354_v52 = vadd.f32 %v353_v43, %v226_v47  ;;  %v371_v53 = vmul.f32 %v226_v47, %v226_v47 }
 0x10e   :  { %537 = vst [vmem:[#allocation7 + $0x38] sm:$0xff] %v529_v48   ;;  %v524_v54 = vpack.c.bf16 %v258_v49, %v255_v37 }
 0x10f   :  { %532 = vst [vmem:[#allocation7 + $0x10] sm:$0xff] %v504_v51   ;;  %v355_v56 = vadd.f32 %v576_v31, %v354_v52  ;;  %v386_v57 = vadd.f32 %v385_v50, %v371_v53 }
 0x110   :  { %536 = vst [vmem:[#allocation7 + $0x30] sm:$0xff] %v524_v54  }
 0x111   :  { %v356_v59 = vadd.f32 %v577_v41, %v355_v56  ;;  %v387_v60 = vadd.f32 %v386_v57, %v372_v55 }
 0x112   :  { %676 = shalt.err (!%p673_p0)
}
 0x113   :  { %409 = dma.vmem_to_hbm [thread:$0]  %s404_s1, 1024, %s815_s2, [#allocation4], %s734_s18, %s734_s18, %s735_s19   ;;  %v374_v61 = vmul.f32 %v779_v19, %v779_v19  ;;  %v388_v62 = vadd.f32 %v387_v60, %v373_v58  ;;  %v357_v63 = vadd.f32 %v356_v59, %v779_v19  ;;  %v375_v1 = vmul.f32 %v242_v26, %v242_v26 }
 0x114   :  { %v376_v3 = vmul.f32 %v777_v17, %v777_v17  ;;  %v377_v6 = vmul.f32 %v781_v21, %v781_v21  ;;  %v378_v10 = vmul.f32 %v255_v37, %v255_v37  ;;  %v379_v14 = vmul.f32 %v258_v49, %v258_v49  ;;  %s738_s2 = smov [#allocation8]   ;;  %s739_s5 = smov [#allocation10]  }
 0x115   :  { %v358_v0 = vadd.f32 %v357_v63, %v242_v26  ;;  %v389_v2 = vadd.f32 %v388_v62, %v374_v61  ;;  %s416_s30 = sshll.u32 %s738_s2, 4  ;;  %v380_v15 = vmul.f32 %v786_v32, %v786_v32  ;;  %s426_s6 = sshll.u32 %s739_s5, 4  ;;  %v381_v18 = vmul.f32 %v585_v42, %v585_v42  ;;  %s417_s30 = int_to_ptr.vmem [resolvable:$true] %s416_s30  ;;  %s427_s6 = int_to_ptr.vmem [resolvable:$true] %s426_s6 }
 0x116   :  { %s685_s7 = scalar_lea.vmem %s417_s30, 128  ;;  %p690_p2 = scmp.lt.s32.totalorder %s417_s30, %s417_s30 }
 0x117   :  { %v359_v4 = vadd.f32 %v777_v17, %v358_v0  ;;  %v390_v5 = vadd.f32 %v389_v2, %v375_v1  ;;  %p686_p1 = scmp.ne.s32.totalorder %s417_s30, %s685_s7  ;;  %p691_p3 = scmp.lt.s32.totalorder %s685_s7, %s685_s7 }
 0x119   :  { %v391_v7 = vadd.f32 %v390_v5, %v376_v3  ;;  %v360_v8 = vadd.f32 %v781_v21, %v359_v4  ;;  %p692_p4 = por %p691_p3, %p690_p2 }
 0x11b   :  { %v361_v9 = vadd.f32 %v360_v8, %v255_v37  ;;  %v392_v11 = vadd.f32 %v391_v7, %v377_v6  ;;  %p693_p5 = pnand %p692_p4, %p686_p1 }
 0x11d   :  { %v393_v12 = vadd.f32 %v392_v11, %v378_v10  ;;  %v362_v13 = vadd.f32 %v361_v9, %v258_v49 }
 0x11f   :  { %v363_v16 = vadd.f32 %v786_v32, %v362_v13  ;;  %v394_v17 = vadd.f32 %v393_v12, %v379_v14 }
 0x121   :  { %v395_v19 = vadd.f32 %v394_v17, %v380_v15  ;;  %v364_v20 = vadd.f32 %v585_v42, %v363_v16 }
 0x123   :  { %365 = vst [vmem:[#allocation8] sm:$0xff] %v364_v20  ;;  %v396_v21 = vadd.f32 %v395_v19, %v381_v18 }
 0x124   :  { %696 = shalt.err (!%p693_p5)
}
 0x125   :  { %419 = dma.vmem_to_hbm [thread:$0]  %s417_s30, 128, %s816_s3, [#allocation9]   ;;  %397 = vst [vmem:[#allocation10] sm:$0xff] %v396_v21 }
 0x126   :  { %s705_s10 = scalar_lea.vmem %s427_s6, 128  ;;  %p710_p7 = scmp.lt.s32.totalorder %s427_s6, %s427_s6 }
 0x127   :  { %p706_p6 = scmp.ne.s32.totalorder %s427_s6, %s705_s10  ;;  %p711_p8 = scmp.lt.s32.totalorder %s705_s10, %s705_s10 }
 0x129   :  { %p712_p9 = por %p711_p8, %p710_p7 }
 0x12b   :  { %p713_p10 = pnand %p712_p9, %p706_p6 }
 0x12d   :  { %716 = shalt.err (!%p713_p10)
}
 0x12e   :  { %429 = dma.vmem_to_hbm [thread:$0]  %s427_s6, 128, %s817_s4, [#allocation9]  }
 0x12f   :  { %729 = dma.done.wait [#allocation4], 1024  }
 0x130   :  { %730 = vsyncadd [#allocation4], 4294966272 }
 0x131   :  { %731 = dma.done.wait [#allocation9], 256  }
 0x132   :  { %732 = vsyncadd [#allocation9], 4294967040 }
 0x133   :  { %439 = vsyncpa [#allocation3], 1 }
 0x134   :  { %440 = vsyncpa [#allocation6], 1 }
 0x135   :  { %441 = vsyncpa [#allocation4], 1 }
 0x136   :  { %442 = vsyncpa [#allocation9], 1 }

</bundles_post_ra>
